<compile_context>
chip_gen: v5e
topology: v5e:2x2
jax: 0.10.0
libtpu: 0.0.40
codegen_flags: <defaults>
</compile_context>

<pallas_src>
import functools

import jax
import jax.numpy as jnp
from jax.experimental import pallas as pl
from jax.experimental.pallas import tpu as pltpu

_LANE = 128
_SUBLANE = 8


def _round_up(x: int, m: int) -> int:
    return (x + m - 1) // m * m


def _mlp_kernel(x_ref, w1_ref, b1_ref, w2_ref, b2_ref, o_ref):
    # Layer 1: Linear + ReLU (MXU matmul, f32 accumulation, fused in VMEM).
    h = jnp.dot(x_ref[...], w1_ref[...], preferred_element_type=jnp.float32)
    h = jnp.maximum(h + b1_ref[...], 0.0)          # b1 is [1, H_pad], f32
    # Layer 2: Linear + ReLU.  Cast the activation to the weight dtype for the
    # MXU (no-op in f32, bf16 when running reduced precision).
    o = jnp.dot(h.astype(w2_ref.dtype), w2_ref[...],
                preferred_element_type=jnp.float32)
    o = jnp.maximum(o + b2_ref[...], 0.0)          # b2 is [1, D_out_pad], f32
    o_ref[...] = o.astype(o_ref.dtype)


def prepare_params(w1, b1, w2, b2):
    """Pad weights/biases to lane multiples ONCE at model-setup time.

    w1: [D_in, H], b1: [H], w2: [H, D_out], b2: [D_out]  (x @ W layout).
    Returns (w1_p, b1_p, w2_p, b2_p) ready for fashion_mnist_model_v1.
    Zero padding is semantically inert through Linear + ReLU.
    """
    d_in, hidden = w1.shape
    d_out = w2.shape[1]
    h_p = _round_up(hidden, _LANE)
    d_out_p = _round_up(d_out, _LANE)
    # NOTE: w1 is padded only along the hidden axis; the 784 contraction dim
    # stays unpadded (full-array-dim BlockSpec handles lane masking in-kernel).
    w1_p = jnp.zeros((d_in, h_p), w1.dtype).at[:, :hidden].set(w1)
    w2_p = jnp.zeros((h_p, d_out_p), w2.dtype).at[:hidden, :d_out].set(w2)
    b1_p = jnp.zeros((1, h_p), jnp.float32).at[0, :hidden].set(
        b1.astype(jnp.float32))
    b2_p = jnp.zeros((1, d_out_p), jnp.float32).at[0, :d_out].set(
        b2.astype(jnp.float32))
    return w1_p, b1_p, w2_p, b2_p


def fashion_mnist_model_v1(x_nchw, w1_p, b1_p, w2_p, b2_p, *, d_out,
                           tile_b_max: int = 2048,
                           out_dtype=jnp.float32,
                           trim_output: bool = True):
    """Forward pass.  x_nchw: [B, C, H, W]; padded params from prepare_params().

    Returns [B, d_out] logits (both ReLUs applied) in out_dtype; set
    trim_output=False to get the padded lane-dense [B, 128] slab instead.
    """
    B = x_nchw.shape[0]
    x = x_nchw.reshape(B, -1)                       # nn.Flatten (plain JAX glue)
    d_in = x.shape[1]
    assert w1_p.shape[0] == d_in, (w1_p.shape, d_in)
    h_p = w1_p.shape[1]
    d_out_p = w2_p.shape[1]

    # Balanced batch tiles; guarantee >= 2 grid steps when there is enough
    # work so the "parallel" batch axis shards across v7x's two TensorCores.
    min_tiles = 2 if B >= 2 * _SUBLANE else 1
    n_tiles = max(pl.cdiv(B, tile_b_max), min_tiles)
    tile_b = _round_up(pl.cdiv(B, n_tiles), _SUBLANE)
    n_tiles = pl.cdiv(B, tile_b)                    # trailing block may be partial

    x_isz = jnp.dtype(x.dtype).itemsize
    cost = pl.CostEstimate(
        flops=2 * B * (d_in * h_p + h_p * d_out_p),
        transcendentals=0,
        bytes_accessed=(B * d_in * x_isz
                        + d_in * h_p * jnp.dtype(w1_p.dtype).itemsize
                        + h_p * d_out_p * jnp.dtype(w2_p.dtype).itemsize
                        + (h_p + d_out_p) * 4
                        + B * d_out_p * jnp.dtype(out_dtype).itemsize),
    )

    out_padded = pl.pallas_call(
        _mlp_kernel,
        out_shape=jax.ShapeDtypeStruct((B, d_out_p), out_dtype),
        grid_spec=pl.GridSpec(
            grid=(n_tiles,),
            in_specs=[
                # x: tiled over batch, full (unpadded) 784 last dim -> no
                # wrapper pad copy; DMA double-buffered behind the matmuls.
                pl.BlockSpec((tile_b, d_in), lambda i: (i, 0)),
                # Weights/biases: constant block index -> VMEM-resident across
                # every batch tile (fetched from HBM once per call).
                pl.BlockSpec((d_in, h_p), lambda i: (0, 0)),
                pl.BlockSpec((1, h_p), lambda i: (0, 0)),
                pl.BlockSpec((h_p, d_out_p), lambda i: (0, 0)),
                pl.BlockSpec((1, d_out_p), lambda i: (0, 0)),
            ],
            out_specs=pl.BlockSpec((tile_b, d_out_p), lambda i: (i, 0)),
        ),
        compiler_params=pltpu.CompilerParams(
            dimension_semantics=("parallel",),
            vmem_limit_bytes=48 * 1024 * 1024),
        cost_estimate=cost,
    )(x, w1_p, b1_p, w2_p, b2_p)

    if trim_output:
        return out_padded[:, :d_out]                # drop lane padding only
    return out_padded


def init_params(key, d_in, hidden, d_out):
    """Deterministic init mimicking nn.Linear's U(-1/sqrt(fan_in), 1/sqrt(fan_in))."""
    k1, k2, k3, k4 = jax.random.split(key, 4)
    lim1 = 1.0 / jnp.sqrt(d_in)
    lim2 = 1.0 / jnp.sqrt(hidden)
    # Stored as [in, out] (transpose of PyTorch's [out, in]) for x @ W.
    w1 = jax.random.uniform(k1, (d_in, hidden), jnp.float32, -lim1, lim1)
    b1 = jax.random.uniform(k2, (hidden,), jnp.float32, -lim1, lim1)
    w2 = jax.random.uniform(k3, (hidden, d_out), jnp.float32, -lim2, lim2)
    b2 = jax.random.uniform(k4, (d_out,), jnp.float32, -lim2, lim2)
    return w1, b1, w2, b2


def _reference(x_nchw, w1, b1, w2, b2):
    """Pure-JAX reference with the same dtype flow as the kernel."""
    x = x_nchw.reshape(x_nchw.shape[0], -1)
    h = jnp.maximum(
        jnp.dot(x, w1, preferred_element_type=jnp.float32)
        + b1.astype(jnp.float32), 0.0)
    o = jnp.dot(h.astype(w2.dtype), w2, preferred_element_type=jnp.float32)
    return jnp.maximum(o + b2.astype(jnp.float32), 0.0)


if __name__ == "__main__":
    # Small FashionMNIST-like shapes: batch=8, 1x28x28 images, hidden=32, 10 classes.
    B, C, H, W = 8, 1, 28, 28
    D_IN = C * H * W          # input_shape = 784
    HIDDEN = 32               # hidden_units
    D_OUT = 10                # output_shape

    key = jax.random.PRNGKey(0)
    kx, kp = jax.random.split(key)
    x = jax.random.normal(kx, (B, C, H, W), jnp.float32)
    w1, b1, w2, b2 = init_params(kp, D_IN, HIDDEN, D_OUT)

    model = jax.jit(functools.partial(fashion_mnist_model_v1, d_out=D_OUT))

    # --- f32 path: strict correctness check -------------------------------
    params_f32 = prepare_params(w1, b1, w2, b2)      # padded once, outside jit
    out = model(x, *params_f32)
    jax.block_until_ready(out)
    ref = _reference(x, w1, b1, w2, b2)
    assert out.shape == (B, D_OUT)
    assert jnp.allclose(out, ref, atol=1e-4, rtol=1e-4), (
        float(jnp.max(jnp.abs(out - ref))))

    # --- bf16 x/weights (halves x HBM traffic); biases/accum stay f32 -----
    x_bf = x.astype(jnp.bfloat16)
    params_bf = prepare_params(w1.astype(jnp.bfloat16), b1,
                               w2.astype(jnp.bfloat16), b2)
    out_bf = model(x_bf, *params_bf)
    jax.block_until_ready(out_bf)
    ref_bf = _reference(x_bf, w1.astype(jnp.bfloat16), b1,
                        w2.astype(jnp.bfloat16), b2)
    assert out_bf.shape == (B, D_OUT)
    assert jnp.allclose(out_bf, ref_bf, atol=1e-2, rtol=1e-2), (
        float(jnp.max(jnp.abs(out_bf - ref_bf))))

    print("KERNEL_OK")
</pallas_src>

<mosaic_0001>
module attributes {stable_mosaic.version = 11 : i64} {
  func.func @_mlp_kernel(%arg0: i32, %arg1: memref<8x784xf32, #tpu.memory_space<vmem>>, %arg2: memref<784x128xf32, #tpu.memory_space<vmem>>, %arg3: memref<1x128xf32, #tpu.memory_space<vmem>>, %arg4: memref<128x128xf32, #tpu.memory_space<vmem>>, %arg5: memref<1x128xf32, #tpu.memory_space<vmem>>, %arg6: memref<8x128xf32, #tpu.memory_space<vmem>>) attributes {dimension_semantics = [#tpu.dimension_semantics<parallel>], iteration_bounds = array<i64: 1>, scalar_prefetch = 0 : i64, scratch_operands = 0 : i64, tpu.core_type = #tpu.core_type<tc>, window_params = [{transform_indices = @transform_0, window_bounds = array<i64: 8, 784>}, {pipeline_mode = #tpu.pipeline_mode<synchronous>, transform_indices = @transform_1, window_bounds = array<i64: 784, 128>}, {pipeline_mode = #tpu.pipeline_mode<synchronous>, transform_indices = @transform_2, window_bounds = array<i64: 1, 128>}, {pipeline_mode = #tpu.pipeline_mode<synchronous>, transform_indices = @transform_3, window_bounds = array<i64: 128, 128>}, {pipeline_mode = #tpu.pipeline_mode<synchronous>, transform_indices = @transform_4, window_bounds = array<i64: 1, 128>}, {transform_indices = @transform_5, window_bounds = array<i64: 8, 128>}]} {
    %c0 = arith.constant 0 : index
    %c0_0 = arith.constant 0 : index
    %0 = vector.load %arg1[%c0, %c0_0] : memref<8x784xf32, #tpu.memory_space<vmem>>, vector<8x784xf32>
    %c0_1 = arith.constant 0 : index
    %c0_2 = arith.constant 0 : index
    %1 = vector.load %arg2[%c0_1, %c0_2] : memref<784x128xf32, #tpu.memory_space<vmem>>, vector<784x128xf32>
    %cst = arith.constant dense<0.000000e+00> : vector<8x128xf32>
    %2 = tpu.matmul %0, %1, %cst {dimension_numbers = #tpu.dot_dimension_numbers<[1], [0], [0], [1], [0, 0, 1, 1], [], []>} : vector<8x784xf32>, vector<784x128xf32>, vector<8x128xf32> -> vector<8x128xf32>
    %c0_3 = arith.constant 0 : index
    %c0_4 = arith.constant 0 : index
    %3 = vector.load %arg3[%c0_3, %c0_4] : memref<1x128xf32, #tpu.memory_space<vmem>>, vector<1x128xf32>
    %4 = vector.broadcast %3 : vector<1x128xf32> to vector<8x128xf32>
    %5 = arith.addf %2, %4 : vector<8x128xf32>
    %cst_5 = arith.constant 0.000000e+00 : f32
    %6 = vector.broadcast %cst_5 : f32 to vector<8x128xf32>
    %7 = arith.maximumf %5, %6 : vector<8x128xf32>
    %c0_6 = arith.constant 0 : index
    %c0_7 = arith.constant 0 : index
    %8 = vector.load %arg4[%c0_6, %c0_7] : memref<128x128xf32, #tpu.memory_space<vmem>>, vector<128x128xf32>
    %cst_8 = arith.constant dense<0.000000e+00> : vector<8x128xf32>
    %9 = tpu.matmul %7, %8, %cst_8 {dimension_numbers = #tpu.dot_dimension_numbers<[1], [0], [0], [1], [0, 0, 1, 1], [], []>} : vector<8x128xf32>, vector<128x128xf32>, vector<8x128xf32> -> vector<8x128xf32>
    %c0_9 = arith.constant 0 : index
    %c0_10 = arith.constant 0 : index
    %10 = vector.load %arg5[%c0_9, %c0_10] : memref<1x128xf32, #tpu.memory_space<vmem>>, vector<1x128xf32>
    %11 = vector.broadcast %10 : vector<1x128xf32> to vector<8x128xf32>
    %12 = arith.addf %9, %11 : vector<8x128xf32>
    %cst_11 = arith.constant 0.000000e+00 : f32
    %13 = vector.broadcast %cst_11 : f32 to vector<8x128xf32>
    %14 = arith.maximumf %12, %13 : vector<8x128xf32>
    %c0_12 = arith.constant 0 : index
    %c0_13 = arith.constant 0 : index
    %15 = vector.load %arg6[%c0_12, %c0_13] : memref<8x128xf32, #tpu.memory_space<vmem>>, vector<8x128xf32>
    tpu.vector_store %arg6[%c0_12, %c0_13], %14 {strides = array<i32>} : memref<8x128xf32, #tpu.memory_space<vmem>>, vector<8x128xf32>,
    return
  }
  func.func @transform_0(%arg0: i32) -> (i32, i32) {
    %c0_i32 = arith.constant 0 : i32
    %c0_i32_0 = arith.constant 0 : i32
    return %arg0, %c0_i32 : i32, i32
  }
  func.func @transform_1(%arg0: i32) -> (i32, i32) {
    %c0_i32 = arith.constant 0 : i32
    %c0_i32_0 = arith.constant 0 : i32
    %c0_i32_1 = arith.constant 0 : i32
    return %c0_i32, %c0_i32_0 : i32, i32
  }
  func.func @transform_2(%arg0: i32) -> (i32, i32) {
    %c0_i32 = arith.constant 0 : i32
    %c0_i32_0 = arith.constant 0 : i32
    %c0_i32_1 = arith.constant 0 : i32
    return %c0_i32, %c0_i32_0 : i32, i32
  }
  func.func @transform_3(%arg0: i32) -> (i32, i32) {
    %c0_i32 = arith.constant 0 : i32
    %c0_i32_0 = arith.constant 0 : i32
    %c0_i32_1 = arith.constant 0 : i32
    return %c0_i32, %c0_i32_0 : i32, i32
  }
  func.func @transform_4(%arg0: i32) -> (i32, i32) {
    %c0_i32 = arith.constant 0 : i32
    %c0_i32_0 = arith.constant 0 : i32
    %c0_i32_1 = arith.constant 0 : i32
    return %c0_i32, %c0_i32_0 : i32, i32
  }
  func.func @transform_5(%arg0: i32) -> (i32, i32) {
    %c0_i32 = arith.constant 0 : i32
    %c0_i32_0 = arith.constant 0 : i32
    return %arg0, %c0_i32 : i32, i32
  }
}

</mosaic_0001>

<bundles_post_ra>
// kernel: fashion_mnist_model_v1.1
= control target key start
LH: loop header
LB: loop body
LE: loop exit
PB: predicated region body
PF: predicated region fallthrough
CT: control target
= control target key end

     0   :  { %10 = vsyncpa [#allocation3], 0  ;;  %s770_s0 = inlined_call_operand.vmem [shape: f32[8,784], index: 0, kind: input, shape index: {}]   ;;  %s771_s1 = inlined_call_operand.vmem [shape: f32[784,128], index: 1, kind: input, shape index: {}]   ;;  %s772_s2 = inlined_call_operand.vmem [shape: f32[1,128], index: 2, kind: input, shape index: {}]   ;;  %s773_s3 = inlined_call_operand.hbm [shape: f32[128,128], index: 3, kind: input, shape index: {}]   ;;  %s774_s4 = inlined_call_operand.vmem [shape: f32[1,128], index: 4, kind: input, shape index: {}]   ;;  %s775_s5 = inlined_call_operand.hbm [shape: f32[8,128], index: 5, kind: output, shape index: {}]  }
   0x1   :  { %11 = vsyncpa [#allocation4], 0  ;;  %s22_s20 = sshll.u32 %s773_s3, 4  ;;  %s409_s21 = smov [#allocation2]   ;;  %s23_s20 = int_to_ptr.hbm [resolvable:$true] %s22_s20 }
   0x2   :  { %s24_s22 = sshll.u32 %s409_s21, 4  ;;  %s410_s23 = smov 128   ;;  %s25_s22 = int_to_ptr.vmem [resolvable:$true] %s24_s22 }
   0x3   :  { %s411_s24 = smov 8  }
   0x4   :  { %30 = dma.hbm_to_vmem [thread:$0]  %s23_s20, 2048, %s25_s22, [#allocation3], %s410_s23, %s410_s23, %s411_s24  }
   0x5   :  { %405 = dma.done.wait [#allocation3], 2048  }
   0x6   :  { %406 = vsyncadd [#allocation3], 4294965248  ;;  %v59_v0 = vld [vmem:[%s771_s1 + $0x78] sm:$0xff]  ;;  %v58_v1 = vld [vmem:[%s771_s1 + $0x70] sm:$0xff]  ;;  %vm146_vm0 = vcmask 130048   ;;  %s340_s6 = sshll.u32 %s775_s5, 4  ;;  %s341_s6 = int_to_ptr.hbm [resolvable:$true] %s340_s6 }
   0x7   :  { %v75_v2 = vld [vmem:[%s771_s1 + $0xf8] sm:$0xff]  ;;  %150 = vmatpush.msra.mxu0 %v59_v0  ;;  %v74_v3 = vld [vmem:[%s771_s1 + $0xf0] sm:$0xff]  ;;  %v57_v4 = vld [vmem:[%s771_s1 + $0x68] sm:$0xff] }
   0x8   :  { %170 = vmatpush.msra.mxu1 %v75_v2  ;;  %v73_v5 = vld [vmem:[%s771_s1 + $0xe8] sm:$0xff]  ;;  %v56_v6 = vld [vmem:[%s771_s1 + $0x60] sm:$0xff]  ;;  %v55_v8 = vld [vmem:[%s771_s1 + $0x58] sm:$0xff] }
   0x9   :  { %151 = vmatpush.msra.mxu0 %v58_v1  ;;  %v72_v7 = vld [vmem:[%s771_s1 + $0xe0] sm:$0xff]  ;;  %v71_v9 = vld [vmem:[%s771_s1 + $0xd8] sm:$0xff]  ;;  %v54_v10 = vld [vmem:[%s771_s1 + $0x50] sm:$0xff] }
   0xa   :  { %171 = vmatpush.msra.mxu1 %v74_v3  ;;  %v91_v11 = vld [vmem:[%s771_s1 + $0x178] sm:$0xff]  ;;  %v70_v12 = vld [vmem:[%s771_s1 + $0xd0] sm:$0xff]  ;;  %v89_v15 = vld [vmem:[%s771_s1 + $0x168] sm:$0xff] }
   0xb   :  { %152 = vmatpush.msra.mxu0 %v57_v4  ;;  %190 = vmatpush.msra.mxu2 %v91_v11  ;;  %v90_v13 = vld [vmem:[%s771_s1 + $0x170] sm:$0xff]  ;;  %v107_v14 = vld [vmem:[%s771_s1 + $0x1f8] sm:$0xff]  ;;  %v53_v17 = vld [vmem:[%s771_s1 + $0x48] sm:$0xff] }
   0xc   :  { %172 = vmatpush.msra.mxu1 %v73_v5  ;;  %v106_v16 = vld [vmem:[%s771_s1 + $0x1f0] sm:$0xff]  ;;  %v69_v18 = vld [vmem:[%s771_s1 + $0xc8] sm:$0xff]  ;;  %210 = vmatpush.msra.mxu3 %v107_v14  ;;  %v88_v19 = vld [vmem:[%s771_s1 + $0x160] sm:$0xff] }
   0xd   :  { %153 = vmatpush.msra.mxu0 %v56_v6  ;;  %191 = vmatpush.msra.mxu2 %v90_v13  ;;  %v105_v20 = vld [vmem:[%s771_s1 + $0x1e8] sm:$0xff]  ;;  %v52_v21 = vld [vmem:[%s771_s1 + $0x40] sm:$0xff]  ;;  %v87_v23 = vld [vmem:[%s771_s1 + $0x158] sm:$0xff] }
   0xe   :  { %173 = vmatpush.msra.mxu1 %v72_v7  ;;  %v68_v22 = vld [vmem:[%s771_s1 + $0xc0] sm:$0xff]  ;;  %211 = vmatpush.msra.mxu3 %v106_v16  ;;  %v51_v25 = vld [vmem:[%s771_s1 + $0x38] sm:$0xff]  ;;  %v86_v27 = vld [vmem:[%s771_s1 + $0x150] sm:$0xff] }
   0xf   :  { %154 = vmatpush.msra.mxu0 %v55_v8  ;;  %192 = vmatpush.msra.mxu2 %v89_v15  ;;  %v104_v24 = vld [vmem:[%s771_s1 + $0x1e0] sm:$0xff]  ;;  %v67_v26 = vld [vmem:[%s771_s1 + $0xb8] sm:$0xff]  ;;  %v50_v29 = vld [vmem:[%s771_s1 + $0x30] sm:$0xff] }
  0x10   :  { %174 = vmatpush.msra.mxu1 %v71_v9  ;;  %212 = vmatpush.msra.mxu3 %v105_v20  ;;  %v103_v28 = vld [vmem:[%s771_s1 + $0x1d8] sm:$0xff]  ;;  %v66_v30 = vld [vmem:[%s771_s1 + $0xb0] sm:$0xff]  ;;  %v85_v31 = vld [vmem:[%s771_s1 + $0x148] sm:$0xff] }
  0x11   :  { %155 = vmatpush.msra.mxu0 %v54_v10  ;;  %193 = vmatpush.msra.mxu2 %v88_v19  ;;  %v102_v32 = vld [vmem:[%s771_s1 + $0x1d0] sm:$0xff]  ;;  %v49_v33 = vld [vmem:[%s771_s1 + $0x28] sm:$0xff]  ;;  %v84_v35 = vld [vmem:[%s771_s1 + $0x140] sm:$0xff] }
  0x12   :  { %175 = vmatpush.msra.mxu1 %v70_v12  ;;  %213 = vmatpush.msra.mxu3 %v104_v24  ;;  %v65_v34 = vld [vmem:[%s771_s1 + $0xa8] sm:$0xff]  ;;  %v48_v37 = vld [vmem:[%s771_s1 + $0x20] sm:$0xff]  ;;  %v83_v39 = vld [vmem:[%s771_s1 + $0x138] sm:$0xff] }
  0x13   :  { %156 = vmatpush.msra.mxu0 %v53_v17  ;;  %194 = vmatpush.msra.mxu2 %v87_v23  ;;  %v101_v36 = vld [vmem:[%s771_s1 + $0x1c8] sm:$0xff]  ;;  %v64_v38 = vld [vmem:[%s771_s1 + $0xa0] sm:$0xff]  ;;  %v47_v41 = vld [vmem:[%s771_s1 + $0x18] sm:$0xff] }
  0x14   :  { %176 = vmatpush.msra.mxu1 %v69_v18  ;;  %214 = vmatpush.msra.mxu3 %v103_v28  ;;  %v100_v40 = vld [vmem:[%s771_s1 + $0x1c0] sm:$0xff]  ;;  %v63_v42 = vld [vmem:[%s771_s1 + $0x98] sm:$0xff]  ;;  %v82_v43 = vld [vmem:[%s771_s1 + $0x130] sm:$0xff] }
  0x15   :  { %157 = vmatpush.msra.mxu0 %v52_v21  ;;  %195 = vmatpush.msra.mxu2 %v86_v27  ;;  %v99_v44 = vld [vmem:[%s771_s1 + $0x1b8] sm:$0xff]  ;;  %v46_v45 = vld [vmem:[%s771_s1 + $0x10] sm:$0xff]  ;;  %v81_v47 = vld [vmem:[%s771_s1 + $0x128] sm:$0xff] }
  0x16   :  { %177 = vmatpush.msra.mxu1 %v68_v22  ;;  %215 = vmatpush.msra.mxu3 %v102_v32  ;;  %v62_v46 = vld [vmem:[%s771_s1 + $0x90] sm:$0xff]  ;;  %v45_v49 = vld [vmem:[%s771_s1 + $0x8] sm:$0xff]  ;;  %v80_v51 = vld [vmem:[%s771_s1 + $0x120] sm:$0xff] }
  0x17   :  { %158 = vmatpush.msra.mxu0 %v51_v25  ;;  %196 = vmatpush.msra.mxu2 %v85_v31  ;;  %v98_v48 = vld [vmem:[%s771_s1 + $0x1b0] sm:$0xff]  ;;  %v61_v50 = vld [vmem:[%s771_s1 + $0x88] sm:$0xff]  ;;  %v44_v53 = vld [vmem:[%s771_s1] sm:$0xff] }
  0x18   :  { %178 = vmatpush.msra.mxu1 %v67_v26  ;;  %216 = vmatpush.msra.mxu3 %v101_v36  ;;  %v97_v52 = vld [vmem:[%s771_s1 + $0x1a8] sm:$0xff]  ;;  %v60_v54 = vld [vmem:[%s771_s1 + $0x80] sm:$0xff]  ;;  %v123_v55 = vld [vmem:[%s771_s1 + $0x278] sm:$0xff] }
  0x19   :  { %159 = vmatpush.msra.mxu0 %v50_v29  ;;  %197 = vmatpush.msra.mxu2 %v84_v35  ;;  %v139_v56 = vld [vmem:[%s771_s1 + $0x2f8] sm:$0xff]  ;;  %v96_v58 = vld [vmem:[%s771_s1 + $0x1a0] sm:$0xff]  ;;  %v122_v59 = vld [vmem:[%s771_s1 + $0x270] sm:$0xff] }
  0x1a   :  { %179 = vmatpush.msra.mxu1 %v66_v30  ;;  %217 = vmatpush.msra.mxu3 %v100_v40  ;;  %v79_v57 = vld [vmem:[%s771_s1 + $0x118] sm:$0xff]  ;;  %v138_v60 = vld [vmem:[%s771_s1 + $0x2f0] sm:$0xff]  ;;  %v121_v63 = vld [vmem:[%s771_s1 + $0x268] sm:$0xff] }
  0x1b   :  { %160 = vmatpush.msra.mxu0 %v49_v33  ;;  %198 = vmatpush.msra.mxu2 %v83_v39  ;;  %v78_v61 = vld [vmem:[%s771_s1 + $0x110] sm:$0xff]  ;;  %v95_v62 = vld [vmem:[%s771_s1 + $0x198] sm:$0xff]  ;;  %v137_v0 = vld [vmem:[%s771_s1 + $0x2e8] sm:$0xff] }
  0x1c   :  { %180 = vmatpush.msra.mxu1 %v65_v34  ;;  %218 = vmatpush.msra.mxu3 %v99_v44  ;;  %v77_v1 = vld [vmem:[%s771_s1 + $0x108] sm:$0xff]  ;;  %v94_v2 = vld [vmem:[%s771_s1 + $0x190] sm:$0xff]  ;;  %v120_v3 = vld [vmem:[%s771_s1 + $0x260] sm:$0xff] }
  0x1d   :  { %161 = vmatpush.msra.mxu0 %v48_v37  ;;  %199 = vmatpush.msra.mxu2 %v82_v43  ;;  %v136_v4 = vld [vmem:[%s771_s1 + $0x2e0] sm:$0xff]  ;;  %v93_v6 = vld [vmem:[%s771_s1 + $0x188] sm:$0xff]  ;;  %v119_v7 = vld [vmem:[%s771_s1 + $0x258] sm:$0xff] }
  0x1e   :  { %181 = vmatpush.msra.mxu1 %v64_v38  ;;  %219 = vmatpush.msra.mxu3 %v98_v48  ;;  %v76_v5 = vld [vmem:[%s771_s1 + $0x100] sm:$0xff]  ;;  %v135_v8 = vld [vmem:[%s771_s1 + $0x2d8] sm:$0xff]  ;;  %v39_v9 = vld [vmem:[%s770_s0 + $0x10] sm:$0xff] }
  0x1f   :  { %162 = vmatpush.msra.mxu0 %v47_v41  ;;  %200 = vmatpush.msra.mxu2 %v81_v47  ;;  %v92_v10 = vld [vmem:[%s771_s1 + $0x180] sm:$0xff]  ;;  %v118_v11 = vld [vmem:[%s771_s1 + $0x250] sm:$0xff]  ;;  %v141_v13 = vld [vmem:[%s771_s1 + $0x308] sm:$0xff] }
  0x20   :  { %182 = vmatpush.msra.mxu1 %v63_v42  ;;  %220 = vmatpush.msra.mxu3 %v97_v52  ;;  %v134_v12 = vld [vmem:[%s771_s1 + $0x2d0] sm:$0xff]  ;;  %v37_v14 = vld [vmem:[%s770_s0] sm:$0xff]  ;;  %v117_v15 = vld [vmem:[%s771_s1 + $0x248] sm:$0xff] }
  0x21   :  { %163 = vmatpush.msra.mxu0 %v46_v45  ;;  %201 = vmatpush.msra.mxu2 %v80_v51  ;;  %v133_v16 = vld [vmem:[%s771_s1 + $0x2c8] sm:$0xff]  ;;  %v40_v17 = vld [vmem:[%s770_s0 + $0x18] sm:$0xff]  ;;  %v116_v19 = vld [vmem:[%s771_s1 + $0x240] sm:$0xff] }
  0x22   :  { %183 = vmatpush.msra.mxu1 %v62_v46  ;;  %221 = vmatpush.msra.mxu3 %v96_v58  ;;  %v38_v18 = vld [vmem:[%s770_s0 + $0x8] sm:$0xff]  ;;  %v132_v20 = vld [vmem:[%s771_s1 + $0x2c0] sm:$0xff]  ;;  %v306_v22 = vld [vmem:[#allocation2 + $0x78] sm:$0xff] }
  0x23   :  { %164 = vmatpush.msra.mxu0 %v45_v49  ;;  %202 = vmatpush.msra.mxu2 %v79_v57  ;;  %v140_v21 = vld [vmem:[%s771_s1 + $0x300] sm:$0xff]  ;;  %v115_v23 = vld [vmem:[%s771_s1 + $0x238] sm:$0xff]  ;;  %v43_v25 = vld [vmem:[%s770_s0 + $0x30] sm:$0xff] }
  0x24   :  { %184 = vmatpush.msra.mxu1 %v61_v50  ;;  %222 = vmatpush.msra.mxu3 %v95_v62  ;;  %v131_v24 = vld [vmem:[%s771_s1 + $0x2b8] sm:$0xff]  ;;  %v305_v26 = vld [vmem:[#allocation2 + $0x70] sm:$0xff]  ;;  %v304_v29 = vld [vmem:[#allocation2 + $0x68] sm:$0xff] }
  0x25   :  { %165 = vmatpush.msra.mxu0 %v44_v53  ;;  %203 = vmatpush.msra.mxu2 %v78_v61  ;;  %v114_v27 = vld [vmem:[%s771_s1 + $0x230] sm:$0xff]  ;;  %v113_v30 = vld [vmem:[%s771_s1 + $0x228] sm:$0xff]  ;;  %v303_v32 = vld [vmem:[#allocation2 + $0x60] sm:$0xff] }
  0x26   :  { %185 = vmatpush.msra.mxu1 %v60_v54  ;;  %223 = vmatpush.msra.mxu3 %v94_v2  ;;  %v130_v28 = vld [vmem:[%s771_s1 + $0x2b0] sm:$0xff]  ;;  %v129_v31 = vld [vmem:[%s771_s1 + $0x2a8] sm:$0xff]  ;;  %v112_v33 = vld [vmem:[%s771_s1 + $0x220] sm:$0xff] }
  0x27   :  { %230 = vmatpush.msrb.mxu0 %v123_v55  ;;  %204 = vmatpush.msra.mxu2 %v77_v1  ;;  %v128_v34 = vld [vmem:[%s771_s1 + $0x2a0] sm:$0xff]  ;;  %v302_v35 = vld [vmem:[#allocation2 + $0x58] sm:$0xff]  ;;  %v301_v38 = vld [vmem:[#allocation2 + $0x50] sm:$0xff] }
  0x28   :  { %250 = vmatpush.msrb.mxu1 %v139_v56  ;;  %224 = vmatpush.msra.mxu3 %v93_v6  ;;  %v111_v36 = vld [vmem:[%s771_s1 + $0x218] sm:$0xff]  ;;  %v110_v39 = vld [vmem:[%s771_s1 + $0x210] sm:$0xff]  ;;  %v300_v41 = vld [vmem:[#allocation2 + $0x48] sm:$0xff] }
  0x29   :  { %231 = vmatpush.msrb.mxu0 %v122_v59  ;;  %205 = vmatpush.msra.mxu2 %v76_v5  ;;  %v127_v37 = vld [vmem:[%s771_s1 + $0x298] sm:$0xff]  ;;  %v126_v40 = vld [vmem:[%s771_s1 + $0x290] sm:$0xff]  ;;  %v109_v42 = vld [vmem:[%s771_s1 + $0x208] sm:$0xff] }
  0x2a   :  { %251 = vmatpush.msrb.mxu1 %v138_v60  ;;  %206 = vmatmul.f32.vlgmr.msra.gmra.mxu2 %v39_v9  ;;  %v125_v43 = vld [vmem:[%s771_s1 + $0x288] sm:$0xff]  ;;  %v108_v44 = vld [vmem:[%s771_s1 + $0x200] sm:$0xff]  ;;  %v298_v49 = vld [vmem:[#allocation2 + $0x38] sm:$0xff] }
  0x2b   :  { %232 = vmatpush.msrb.mxu0 %v121_v63  ;;  %225 = vmatpush.msra.mxu3 %v92_v10  ;;  %v124_v45 = vld [vmem:[%s771_s1 + $0x280] sm:$0xff]  ;;  %v42_v47 = vld [vmem:[%s770_s0 + $0x28] sm:$0xff]  ;;  %v297_v50 = vld [vmem:[#allocation2 + $0x30] sm:$0xff] }
  0x2c   :  { %252 = vmatpush.msrb.mxu1 %v137_v0  ;;  %284 = vmatpush.msrb.mxu2 %v141_v13  ;;  %v41_v46 = vld [vmem:[%s770_s0 + $0x20] sm:$0xff]  ;;  %v296_v51 = vld [vmem:[#allocation2 + $0x28] sm:$0xff]  ;;  %v294_v53 = vld [vmem:[#allocation2 + $0x18] sm:$0xff] }
  0x2d   :  { %233 = vmatpush.msrb.mxu0 %v120_v3  ;;  %226 = vmatmul.f32.vlgmr.msra.gmra.mxu3 %v40_v17  ;;  %v299_v48 = vld [vmem:[#allocation2 + $0x40] sm:$0xff]  ;;  %v293_v54 = vld [vmem:[#allocation2 + $0x10] sm:$0xff]  ;;  %v292_v55 = vld [vmem:[#allocation2 + $0x8] sm:$0xff] }
  0x2e   :  { %253 = vmatpush.msrb.mxu1 %v136_v4  ;;  %166 = vmatmul.f32.vlgmr.msra.gmra.mxu0 %v37_v14  ;;  %v295_v52 = vld [vmem:[#allocation2 + $0x20] sm:$0xff] }
  0x2f   :  { %234 = vmatpush.msrb.mxu0 %v119_v7  ;;  %186 = vmatmul.f32.vlgmr.msra.gmra.mxu1 %v38_v18  ;;  %v291_v56 = vld [vmem:[#allocation2] sm:$0xff] }
  0x30   :  { %254 = vmatpush.msrb.mxu1 %v135_v8  ;;  %285 = vmatpush.msrb.mxu2 %v140_v21  ;;  %v355_v57 = vld [vmem:[%s772_s2] ss:$0 sm:$0xff]  ;;  %s412_s2 = smov [#allocation5]  }
  0x31   :  { %235 = vmatpush.msrb.mxu0 %v118_v11  ;;  %311 = vmatpush.msrb.mxu3 %v306_v22  ;;  %v356_v9 = vld [vmem:[%s774_s4] ss:$0 sm:$0xff]  ;;  %s338_s29 = sshll.u32 %s412_s2, 4  ;;  %s339_s29 = int_to_ptr.vmem [resolvable:$true] %s338_s29 }
  0x32   :  { %255 = vmatpush.msrb.mxu1 %v134_v12  ;;  %350 = vmatmul.msk.f32.vlgmr.msrb.gmra.mxu2 %vm146_vm0, %v43_v25 }
  0x33   :  { %236 = vmatpush.msrb.mxu0 %v117_v15  ;;  %312 = vmatpush.msrb.mxu3 %v305_v26 }
  0x34   :  { %256 = vmatpush.msrb.mxu1 %v133_v16 }
  0x35   :  { %237 = vmatpush.msrb.mxu0 %v116_v19  ;;  %313 = vmatpush.msrb.mxu3 %v304_v29 }
  0x36   :  { %257 = vmatpush.msrb.mxu1 %v132_v20 }
  0x37   :  { %238 = vmatpush.msrb.mxu0 %v115_v23  ;;  %314 = vmatpush.msrb.mxu3 %v303_v32 }
  0x38   :  { %258 = vmatpush.msrb.mxu1 %v131_v24 }
  0x39   :  { %239 = vmatpush.msrb.mxu0 %v114_v27  ;;  %315 = vmatpush.msrb.mxu3 %v302_v35 }
  0x3a   :  { %259 = vmatpush.msrb.mxu1 %v130_v28 }
  0x3b   :  { %240 = vmatpush.msrb.mxu0 %v113_v30  ;;  %316 = vmatpush.msrb.mxu3 %v301_v38 }
  0x3c   :  { %260 = vmatpush.msrb.mxu1 %v129_v31 }
  0x3d   :  { %241 = vmatpush.msrb.mxu0 %v112_v33  ;;  %317 = vmatpush.msrb.mxu3 %v300_v41 }
  0x3e   :  { %261 = vmatpush.msrb.mxu1 %v128_v34 }
  0x3f   :  { %242 = vmatpush.msrb.mxu0 %v111_v36  ;;  %318 = vmatpush.msrb.mxu3 %v299_v48 }
  0x40   :  { %262 = vmatpush.msrb.mxu1 %v127_v37 }
  0x41   :  { %243 = vmatpush.msrb.mxu0 %v110_v39  ;;  %319 = vmatpush.msrb.mxu3 %v298_v49 }
  0x42   :  { %263 = vmatpush.msrb.mxu1 %v126_v40 }
  0x43   :  { %244 = vmatpush.msrb.mxu0 %v109_v42  ;;  %320 = vmatpush.msrb.mxu3 %v297_v50 }
  0x44   :  { %264 = vmatpush.msrb.mxu1 %v125_v43 }
  0x45   :  { %245 = vmatpush.msrb.mxu0 %v108_v44  ;;  %321 = vmatpush.msrb.mxu3 %v296_v51 }
  0x46   :  { %265 = vmatpush.msrb.mxu1 %v124_v45  ;;  %246 = vmatmul.f32.vlgmr.msrb.gmra.mxu0 %v41_v46 }
  0x47   :  { %266 = vmatmul.f32.vlgmr.msrb.gmra.mxu1 %v42_v47  ;;  %322 = vmatpush.msrb.mxu3 %v295_v52 }
  0x49   :  { %323 = vmatpush.msrb.mxu3 %v294_v53 }
  0x4b   :  { %324 = vmatpush.msrb.mxu3 %v293_v54 }
  0x4d   :  { %325 = vmatpush.msrb.mxu3 %v292_v55 }
  0x4f   :  { %326 = vmatpush.msrb.mxu3 %v291_v56 }
  0xab   :  { %v167_v58 = vpop.f32.mrf.mxu0 }
  0xac   :  { %v168_v59 = vadd.f32 %v355_v57, %v167_v58  ;;  %v187_v60 = vpop.f32.mrf.mxu1 }
  0xad   :  { %v207_v62 = vpop.f32.mrf.mxu2 }
  0xae   :  { %v188_v61 = vadd.f32 %v187_v60, %v168_v59 }
  0xb0   :  { %v208_v63 = vadd.f32 %v207_v62, %v188_v61  ;;  %v227_v0 = vpop.f32.mrf.mxu3 }
  0xb2   :  { %v228_v1 = vadd.f32 %v227_v0, %v208_v63 }
  0xb5   :  { %v287_v5 = vpop.f32.mrf.mxu2 }
  0xc3   :  { %v247_v2 = vpop.f32.mrf.mxu0 }
  0xc4   :  { %v267_v3 = vpop.f32.mrf.mxu1  ;;  %v248_v4 = vadd.f32 %v247_v2, %v228_v1 }
  0xc6   :  { %v268_v6 = vadd.f32 %v267_v3, %v248_v4 }
  0xc8   :  { %v288_v7 = vadd.f32 %v287_v5, %v268_v6 }
  0xca   :  { %v290_v8 = vmax.f32 %v288_v7, 0.0 }
  0xcc   :  { %327 = vmatmul.f32.vlgmr.msrb.gmra.mxu3 %v290_v8 }
 0x14f   :  { %v328_v10 = vpop.f32.mrf.mxu3 }
 0x150   :  { %v329_v11 = vadd.f32 %v356_v9, %v328_v10 }
 0x152   :  { %v331_v12 = vmax.f32 %v329_v11, 0.0 }
 0x154   :  { %332 = vst [vmem:[#allocation5] sm:$0xff] %v331_v12 }
 0x155   :  { %343 = dma.vmem_to_hbm [thread:$0]  %s339_s29, 128, %s341_s6, [#allocation4]  }
 0x156   :  { %407 = dma.done.wait [#allocation4], 128  }
 0x157   :  { %408 = vsyncadd [#allocation4], 4294967168 }
 0x158   :  { %348 = vsyncpa [#allocation3], 1 }
 0x159   :  { %349 = vsyncpa [#allocation4], 1 }

</bundles_post_ra>
